<compile_context>
chip_gen: v5e
topology: v5e:2x2
jax: 0.10.0
libtpu: 0.0.40
codegen_flags: <defaults>
</compile_context>

<pallas_src>
import jax
import jax.numpy as jnp
from jax.experimental import pallas as pl
from jax.experimental.pallas import tpu as pltpu


def _round_up(x, m):
    return (x + m - 1) // m * m


def _cdiv(a, b):
    return -(-a // b)


# Conservative budget for the double-buffered x/out tiles: well inside v5e's
# 16 MiB default scoped VMEM and v7x's 64 MiB physical VMEM.
_VMEM_TILE_BUDGET_BYTES = 8 * 1024 * 1024


def _choose_batch_tile(b_align, batch_tile, bytes_per_row):
    """Pick the batch tile (multiple of 8) for the 1-D 'parallel' grid."""
    batch_tile = _round_up(max(int(batch_tile), 8), 8)
    # Cap so 2 buffers of the x tile + 2 buffers of the out tile fit the budget.
    cap = max(8, (_VMEM_TILE_BUDGET_BYTES // (2 * bytes_per_row)) // 8 * 8)
    batch_tile = min(batch_tile, cap)
    n_steps = max(1, _cdiv(b_align, batch_tile))
    # Large batch but a single grid step: split in two so v7x's second
    # TensorCore gets work via the "parallel" axis (the extra ~0.35us step is
    # noise at this size on 1-TC v5e/v6e).
    if n_steps == 1 and b_align >= 1024:
        n_steps = 2
    return min(_round_up(_cdiv(b_align, n_steps), 8), b_align)


def _linear_module_kernel(x_ref, w_ref, b_ref, o_ref):
    # Single MXU matmul (f32 accumulation) + bias add + relu.
    y = jnp.dot(x_ref[...], w_ref[...], preferred_element_type=jnp.float32)
    y = y + b_ref[...]                       # (1, out_dim) broadcast over rows
    o_ref[...] = jnp.maximum(y, 0.0).astype(o_ref.dtype)


def prepare_linear_module_params(field_center, weight, bias, *,
                                 compute_dtype=jnp.float32):
    """One-time parameter prep (module init), NOT the per-call forward path.

    Folds the field_center into the bias,
        (x - c) @ W^T + b == x @ W^T + (b - c @ W^T),
    and pre-transposes W to (D, out_dim).  The fold is done in f32; W is then
    cast to `compute_dtype` (use jnp.bfloat16 for the fast MXU path).
    """
    w_t = weight.astype(jnp.float32).T                               # (D, out_dim)
    b_fold = bias.astype(jnp.float32) - field_center.astype(jnp.float32) @ w_t
    return w_t.astype(compute_dtype), b_fold.reshape(1, -1)          # b_fold stays f32


def linear_module_apply(semantic_vec, w_t, b_fold, *, batch_tile=2048):
    """relu((semantic_vec - field_center) @ W^T + b) with folded params.

    semantic_vec: (B, D).  w_t: (D, out_dim) (f32 or bf16), b_fold: (1, out_dim)
    f32 from prepare_linear_module_params().  Returns (B, out_dim) f32.
    """
    compute_dtype = w_t.dtype
    x = semantic_vec
    if x.dtype != compute_dtype:
        # Ideally the producer already supplies `compute_dtype`; this cast is a
        # small extra XLA op only when it does not.
        x = x.astype(compute_dtype)

    B, D = x.shape
    out_dim = w_t.shape[1]

    x_item = jnp.dtype(compute_dtype).itemsize
    bytes_per_row = D * x_item + out_dim * 4
    b_align = _round_up(B, 8)
    tb = _choose_batch_tile(b_align, batch_tile, bytes_per_row)
    b_pad = _round_up(b_align, tb)
    if b_pad != B:
        # Padded rows evaluate to relu(b_fold) (nonzero) and are sliced off
        # below; never reduce over the padded buffer directly.
        x = jnp.pad(x, ((0, b_pad - B), (0, 0)))

    cost = pl.CostEstimate(
        flops=2 * b_pad * D * out_dim,
        transcendentals=0,
        bytes_accessed=(b_pad * D * x_item + D * out_dim * x_item
                        + out_dim * 4 + b_pad * out_dim * 4),
    )

    out = pl.pallas_call(
        _linear_module_kernel,
        out_shape=jax.ShapeDtypeStruct((b_pad, out_dim), jnp.float32),
        grid_spec=pltpu.PrefetchScalarGridSpec(
            num_scalar_prefetch=0,
            grid=(b_pad // tb,),
            in_specs=[
                pl.BlockSpec((tb, D), lambda i: (i, 0)),         # x tile
                pl.BlockSpec((D, out_dim), lambda i: (0, 0)),    # W (resident)
                pl.BlockSpec((1, out_dim), lambda i: (0, 0)),    # folded bias
            ],
            out_specs=pl.BlockSpec((tb, out_dim), lambda i: (i, 0)),
        ),
        compiler_params=pltpu.CompilerParams(
            dimension_semantics=("parallel",),   # batch axis -> megacore on v7x
            vmem_limit_bytes=32 * 1024 * 1024,   # above v5e's 16 MiB default
        ),
        cost_estimate=cost,
    )(x, w_t, b_fold)

    if b_pad != B:
        out = out[:B]
    return out


def make_linear_module(field_center, weight, bias, *,
                       compute_dtype=jnp.float32, batch_tile=2048):
    """Build a jitted forward with the W/bias prep hoisted out of the call."""
    w_t, b_fold = prepare_linear_module_params(field_center, weight, bias,
                                               compute_dtype=compute_dtype)

    @jax.jit
    def forward(semantic_vec):
        return linear_module_apply(semantic_vec, w_t, b_fold,
                                   batch_tile=batch_tile)

    return forward


def reference(semantic_vec, field_center, weight, bias):
    # Exact PyTorch-module semantics (no fold) for checking.
    return jnp.maximum((semantic_vec - field_center) @ weight.T + bias, 0.0)


if __name__ == "__main__":
    # Small shapes consistent with the module: semantic_vec (B, D), D-dim
    # field_center, nn.Linear(D, out_dim).
    B, D, out_dim = 8, 32, 16

    key = jax.random.PRNGKey(0)
    k_x, k_c, k_w, k_b = jax.random.split(key, 4)

    x = jax.random.normal(k_x, (B, D), dtype=jnp.float32)
    field_center = jax.random.normal(k_c, (D,), dtype=jnp.float32)

    # nn.Linear-style init: uniform(-1/sqrt(D), 1/sqrt(D)).
    bound = 1.0 / jnp.sqrt(D)
    weight = jax.random.uniform(k_w, (out_dim, D), dtype=jnp.float32,
                                minval=-bound, maxval=bound)
    bias = jax.random.uniform(k_b, (out_dim,), dtype=jnp.float32,
                              minval=-bound, maxval=bound)

    ref = reference(x, field_center, weight, bias)

    # f32 path: matches the module numerically.
    fwd_f32 = make_linear_module(field_center, weight, bias)
    out = jax.block_until_ready(fwd_f32(x))
    assert out.shape == (B, out_dim)
    assert jnp.allclose(out, ref, atol=1e-5, rtol=1e-5), "f32 mismatch vs reference"

    # bf16 MXU-feed path: halves x/W traffic, f32 accumulate; looser tolerance.
    fwd_bf16 = make_linear_module(field_center, weight, bias,
                                  compute_dtype=jnp.bfloat16)
    out_bf16 = jax.block_until_ready(fwd_bf16(x))
    assert out_bf16.shape == (B, out_dim)
    assert jnp.allclose(out_bf16, ref, atol=5e-2, rtol=5e-2), "bf16 mismatch vs reference"

    print("KERNEL_OK")
</pallas_src>

<mosaic_0001>
module attributes {stable_mosaic.version = 11 : i64} {
  func.func @_linear_module_kernel(%arg0: i32, %arg1: memref<8x32xf32, #tpu.memory_space<vmem>>, %arg2: memref<32x16xf32, #tpu.memory_space<vmem>>, %arg3: memref<1x16xf32, #tpu.memory_space<vmem>>, %arg4: memref<8x16xf32, #tpu.memory_space<vmem>>) attributes {dimension_semantics = [#tpu.dimension_semantics<parallel>], iteration_bounds = array<i64: 1>, scalar_prefetch = 0 : i64, scratch_operands = 0 : i64, tpu.core_type = #tpu.core_type<tc>, window_params = [{transform_indices = @transform_0, window_bounds = array<i64: 8, 32>}, {pipeline_mode = #tpu.pipeline_mode<synchronous>, transform_indices = @transform_1, window_bounds = array<i64: 32, 16>}, {pipeline_mode = #tpu.pipeline_mode<synchronous>, transform_indices = @transform_2, window_bounds = array<i64: 1, 16>}, {transform_indices = @transform_3, window_bounds = array<i64: 8, 16>}]} {
    %c0 = arith.constant 0 : index
    %c0_0 = arith.constant 0 : index
    %0 = vector.load %arg1[%c0, %c0_0] : memref<8x32xf32, #tpu.memory_space<vmem>>, vector<8x32xf32>
    %c0_1 = arith.constant 0 : index
    %c0_2 = arith.constant 0 : index
    %1 = vector.load %arg2[%c0_1, %c0_2] : memref<32x16xf32, #tpu.memory_space<vmem>>, vector<32x16xf32>
    %cst = arith.constant dense<0.000000e+00> : vector<8x16xf32>
    %2 = tpu.matmul %0, %1, %cst {dimension_numbers = #tpu.dot_dimension_numbers<[1], [0], [0], [1], [0, 0, 1, 1], [], []>} : vector<8x32xf32>, vector<32x16xf32>, vector<8x16xf32> -> vector<8x16xf32>
    %c0_3 = arith.constant 0 : index
    %c0_4 = arith.constant 0 : index
    %3 = vector.load %arg3[%c0_3, %c0_4] : memref<1x16xf32, #tpu.memory_space<vmem>>, vector<1x16xf32>
    %4 = vector.broadcast %3 : vector<1x16xf32> to vector<8x16xf32>
    %5 = arith.addf %2, %4 : vector<8x16xf32>
    %cst_5 = arith.constant 0.000000e+00 : f32
    %6 = vector.broadcast %cst_5 : f32 to vector<8x16xf32>
    %7 = arith.maximumf %5, %6 : vector<8x16xf32>
    %c0_6 = arith.constant 0 : index
    %c0_7 = arith.constant 0 : index
    %8 = vector.load %arg4[%c0_6, %c0_7] : memref<8x16xf32, #tpu.memory_space<vmem>>, vector<8x16xf32>
    tpu.vector_store %arg4[%c0_6, %c0_7], %7 {strides = array<i32>} : memref<8x16xf32, #tpu.memory_space<vmem>>, vector<8x16xf32>,
    return
  }
  func.func @transform_0(%arg0: i32) -> (i32, i32) {
    %c0_i32 = arith.constant 0 : i32
    %c0_i32_0 = arith.constant 0 : i32
    return %arg0, %c0_i32 : i32, i32
  }
  func.func @transform_1(%arg0: i32) -> (i32, i32) {
    %c0_i32 = arith.constant 0 : i32
    %c0_i32_0 = arith.constant 0 : i32
    %c0_i32_1 = arith.constant 0 : i32
    return %c0_i32, %c0_i32_0 : i32, i32
  }
  func.func @transform_2(%arg0: i32) -> (i32, i32) {
    %c0_i32 = arith.constant 0 : i32
    %c0_i32_0 = arith.constant 0 : i32
    %c0_i32_1 = arith.constant 0 : i32
    return %c0_i32, %c0_i32_0 : i32, i32
  }
  func.func @transform_3(%arg0: i32) -> (i32, i32) {
    %c0_i32 = arith.constant 0 : i32
    %c0_i32_0 = arith.constant 0 : i32
    return %arg0, %c0_i32 : i32, i32
  }
}

</mosaic_0001>

<bundles_post_ra>
// kernel: forward.1
= control target key start
LH: loop header
LB: loop body
LE: loop exit
PB: predicated region body
PF: predicated region fallthrough
CT: control target
= control target key end

     0   :  { %8 = vsyncpa [#allocation3], 0  ;;  %s221_s0 = inlined_call_operand.hbm [shape: f32[8,32], index: 0, kind: input, shape index: {}]   ;;  %s222_s1 = inlined_call_operand.hbm [shape: f32[32,16], index: 1, kind: input, shape index: {}]   ;;  %s223_s2 = inlined_call_operand.vmem [shape: f32[1,16], index: 2, kind: input, shape index: {}]   ;;  %s224_s3 = inlined_call_operand.hbm [shape: f32[8,16], index: 3, kind: output, shape index: {}]  }
   0x1   :  { %9 = vsyncpa [#allocation6], 0 }
   0x2   :  { %10 = vsyncpa [#allocation4], 0  ;;  %s16_s14 = sshll.u32 %s221_s0, 4  ;;  %s184_s15 = smov [#allocation2]   ;;  %s17_s14 = int_to_ptr.hbm [resolvable:$true] %s16_s14 }
   0x3   :  { %s18_s16 = sshll.u32 %s184_s15, 4  ;;  %s26_s19 = sshll.u32 %s222_s1, 4  ;;  %s19_s16 = int_to_ptr.vmem [resolvable:$true] %s18_s16  ;;  %s27_s19 = int_to_ptr.hbm [resolvable:$true] %s26_s19 }
   0x4   :  { %21 = dma.hbm_to_vmem [thread:$0]  %s17_s14, 128, %s19_s16, [#allocation3]  }
   0x5   :  { %s185_s20 = smov [#allocation5]   ;;  %s186_s22 = smov 128  }
   0x6   :  { %s28_s21 = sshll.u32 %s185_s20, 4  ;;  %s187_s23 = smov 8   ;;  %s29_s21 = int_to_ptr.vmem [resolvable:$true] %s28_s21 }
   0x7   :  { %34 = dma.hbm_to_vmem [thread:$0]  %s27_s19, 512, %s29_s21, [#allocation6], %s186_s22, %s186_s22, %s187_s23  }
   0x8   :  { %178 = dma.done.wait [#allocation3], 128  }
   0x9   :  { %179 = vsyncadd [#allocation3], 4294967168 }
   0xa   :  { %180 = dma.done.wait [#allocation6], 512  }
   0xb   :  { %181 = vsyncadd [#allocation6], 4294966784  ;;  %v49_v0 = vld [vmem:[#allocation5 + $0x18] sm:$0xff]  ;;  %v48_v1 = vld [vmem:[#allocation5 + $0x10] sm:$0xff]  ;;  %vm54_vm0 = vcmask 261120   ;;  %s188_s24 = smov [#allocation7]  }
   0xc   :  { %70 = vmatpush.msra.mxu0 %v49_v0  ;;  %v47_v2 = vld [vmem:[#allocation5 + $0x8] sm:$0xff]  ;;  %v46_v3 = vld [vmem:[#allocation5] sm:$0xff]  ;;  %v45_v4 = vld [vmem:[#allocation2] sm:$0xff]  ;;  %s86_s25 = sshll.u32 %s188_s24, 4  ;;  %s88_s28 = sshll.u32 %s224_s3, 4  ;;  %vm79_vm1 = vcmask 130048   ;;  %s87_s25 = int_to_ptr.vmem [resolvable:$true] %s86_s25  ;;  %s89_s28 = int_to_ptr.hbm [resolvable:$true] %s88_s28 }
   0xd   :  { %v105_v5 = vld [vmem:[%s223_s2] ss:$0 sm:$0xff] }
   0xe   :  { %71 = vmatpush.msra.mxu0 %v48_v1 }
  0x10   :  { %72 = vmatpush.msra.mxu0 %v47_v2 }
  0x12   :  { %73 = vmatpush.msra.mxu0 %v46_v3 }
  0x13   :  { %99 = vmatmul.msk.f32.vlgmr.msra.gmra.mxu0 %vm54_vm0, %v45_v4 }
  0x90   :  { %v75_v6 = vpop.f32.mrf.mxu0 }
  0x91   :  { %v76_v7 = vadd.f32 %v105_v5, %v75_v6 }
  0x93   :  { %v78_v8 = vmax.f32 %v76_v7, 0.0 }
  0x95   :  { %80 = vst.msk [vmem:[#allocation7] sm:$0xff] %vm79_vm1, %v78_v8 }
  0x96   :  { %91 = dma.vmem_to_hbm [thread:$0]  %s87_s25, 128, %s89_s28, [#allocation4]  }
  0x97   :  { %182 = dma.done.wait [#allocation4], 128  }
  0x98   :  { %183 = vsyncadd [#allocation4], 4294967168 }
  0x99   :  { %96 = vsyncpa [#allocation3], 1 }
  0x9a   :  { %97 = vsyncpa [#allocation6], 1 }
  0x9b   :  { %98 = vsyncpa [#allocation4], 1 }

</bundles_post_ra>
